<compile_context>
chip_gen: v7x
topology: tpu7x:2x2x1
jax: 0.10.0
libtpu: 0.0.40
codegen_flags: <defaults>
</compile_context>

<pallas_src>
import math

import jax
import jax.numpy as jnp
from jax import lax
from jax.experimental import pallas as pl
from jax.experimental.pallas import tpu as pltpu


_BIG_NEG = -1e30  # finite "minus infinity": avoids inf-inf NaNs under masking


# ---------------------------------------------------------------------------
# Lane-dense tiled GEMM (+bias): used for the hoisted fused QKV projection.
# ---------------------------------------------------------------------------
def _matmul_bias_kernel(x_ref, w_ref, b_ref, o_ref, acc_ref):
    @pl.when(pl.program_id(2) == 0)
    def _init():
        acc_ref[...] = jnp.zeros_like(acc_ref)

    acc_ref[...] += jnp.dot(x_ref[...], w_ref[...],
                            preferred_element_type=jnp.float32)

    @pl.when(pl.program_id(2) == pl.num_programs(2) - 1)
    def _finalize():
        o_ref[...] = (acc_ref[...] + b_ref[...]).astype(o_ref.dtype)


def _linear(x2d, w, b, *, out_dtype, tm=256, tn=128, tk=256):
    """y = x2d @ w + b as a tiled Pallas matmul; XLA fallback if tiles don't divide."""
    M, K = x2d.shape
    K2, N = w.shape
    assert K == K2
    tm, tn, tk = min(tm, M), min(tn, N), min(tk, K)
    ok = (M % tm == 0 and N % tn == 0 and K % tk == 0
          and (tm == M or tm % 8 == 0)
          and (tn == N or tn % 128 == 0)
          and (tk == K or tk % 128 == 0))
    if not ok:
        # TODO(synk): pad to tile boundaries instead of falling back to XLA.
        return (jnp.dot(x2d, w, preferred_element_type=jnp.float32)
                + b.astype(jnp.float32)).astype(out_dtype)
    b2 = b.reshape(1, N).astype(jnp.float32)
    return pl.pallas_call(
        _matmul_bias_kernel,
        out_shape=jax.ShapeDtypeStruct((M, N), out_dtype),
        grid_spec=pltpu.PrefetchScalarGridSpec(
            num_scalar_prefetch=0,
            grid=(M // tm, N // tn, K // tk),
            in_specs=[
                pl.BlockSpec((tm, tk), lambda i, j, k: (i, k)),
                pl.BlockSpec((tk, tn), lambda i, j, k: (k, j)),
                pl.BlockSpec((1, tn), lambda i, j, k: (0, j)),
            ],
            out_specs=pl.BlockSpec((tm, tn), lambda i, j, k: (i, j)),
            scratch_shapes=[pltpu.VMEM((tm, tn), jnp.float32)]),
        compiler_params=pltpu.CompilerParams(
            dimension_semantics=("parallel", "parallel", "arbitrary")),
    )(x2d, w, b2)


# ---------------------------------------------------------------------------
# Flash-attention kernel: pre-projected q/k/v, fused c_proj in the finalize.
# ---------------------------------------------------------------------------
def _flash_attn_kernel(n_head, head_dim, n_embd, tq, tk, compute_dtype,
                       use_approx_recip):
    def kernel(q_ref, k_ref, v_ref, wp_ref, bp_ref, o_ref,
               m_scr, l_scr, acc_scr):
        qi = pl.program_id(1)
        ki = pl.program_id(2)
        nk = pl.num_programs(2)

        first_row = qi * tq
        last_row = first_row + tq - 1
        first_col = ki * tk
        last_col = first_col + tk - 1

        # ---- first KV step of this q block: reset the online-softmax state
        @pl.when(ki == 0)
        def _init():
            m_scr[...] = jnp.full_like(m_scr, _BIG_NEG)
            l_scr[...] = jnp.zeros_like(l_scr)
            acc_scr[...] = jnp.zeros_like(acc_scr)

        def scores():
            q = q_ref[0]                                           # (H, tq, hd)
            k = k_ref[0]                                           # (H, tk, hd)
            # contract head_dim of q with head_dim of k (no transpose)
            return lax.dot_general(
                q, k,
                dimension_numbers=(((2,), (2,)), ((0,), (0,))),
                preferred_element_type=jnp.float32)                # (H, tq, tk)

        def online_softmax_update(s):
            v = v_ref[0]                                           # (H, tk, hd)
            m_prev = m_scr[...]
            m_new = jnp.maximum(m_prev, jnp.max(s, axis=-1, keepdims=True))
            alpha = jnp.exp(m_prev - m_new)                        # (H, tq, 1)
            p = jnp.exp(s - m_new)                                 # (H, tq, tk)
            l_scr[...] = alpha * l_scr[...] + jnp.sum(p, axis=-1, keepdims=True)
            pv = lax.dot_general(
                p.astype(compute_dtype), v,
                dimension_numbers=(((2,), (1,)), ((0,), (0,))),
                preferred_element_type=jnp.float32)                # (H, tq, hd)
            acc_scr[...] = alpha * acc_scr[...] + pv
            m_scr[...] = m_new

        block_full = last_col <= first_row          # fully below the diagonal
        block_needed = first_col <= last_row        # not entirely above it

        # ---- interior path: no mask math at all
        @pl.when(block_full)
        def _interior():
            online_softmax_update(scores())

        # ---- diagonal path: additive finite-neg causal mask
        @pl.when(jnp.logical_and(block_needed, jnp.logical_not(block_full)))
        def _diagonal():
            s = scores()
            row = lax.broadcasted_iota(jnp.int32, (1, tq, tk), 1) + first_row
            col = lax.broadcasted_iota(jnp.int32, (1, tq, tk), 2) + first_col
            s = s + jnp.where(col <= row, 0.0, _BIG_NEG)
            online_softmax_update(s)

        # ---- last KV step: normalize, project heads back to C, write out
        @pl.when(ki == nk - 1)
        def _finalize():
            inv_l = pl.reciprocal(l_scr[...], approx=use_approx_recip)
            y = (acc_scr[...] * inv_l).astype(compute_dtype)       # (H, tq, hd)
            # c_proj: accumulate per-head 2-D matmuls straight into a single
            # lane-dense (tq, C) f32 buffer (no (H, tq, C) partial, no
            # cross-head XLU reduction).
            out = jnp.dot(y[0], wp_ref[0], preferred_element_type=jnp.float32)
            for h in range(1, n_head):
                out = out + jnp.dot(y[h], wp_ref[h],
                                    preferred_element_type=jnp.float32)
            o_ref[0] = (out + bp_ref[...]).astype(o_ref.dtype)

    return kernel


def causal_self_attention(x, w_qkv, b_qkv, w_proj, b_proj, *, n_head,
                          block_q=256, block_k=256,
                          compute_dtype=jnp.bfloat16,
                          vmem_limit_bytes=48 * 1024 * 1024):
    """Fused causal self-attention forward (== CausalSelfAttention.forward).

    x:      (B, T, C)
    w_qkv:  (C, 3C)  -- nn.Linear(C, 3C).weight pre-transposed to (in, out)
    b_qkv:  (3C,)
    w_proj: (C, C)   -- nn.Linear(C, C).weight pre-transposed to (in, out)
    b_proj: (C,)

    Tuning per generation: v6e/v5e (128 MiB VMEM) tolerate larger tiles and a
    64-96 MiB vmem limit; v7x (64 MiB VMEM, 2 TCs) should stay around the
    defaults (tq=tk<=256, <=48 MiB) and keep B*(T//tq) >= 2 for TC balance.
    """
    B, T, C = x.shape
    assert C % n_head == 0
    hd = C // n_head
    tq = min(block_q, T)
    tk = min(block_k, T)
    assert T % tq == 0 and T % tk == 0, "T must be divisible by the block sizes"
    assert tq == T or tq % 8 == 0, "q block must be a multiple of 8 sublanes"
    assert tk == T or tk % 8 == 0, "kv block must be a multiple of 8 sublanes"

    cdt = jax.dtypes.canonicalize_dtype(compute_dtype)
    use_approx = bool(cdt == jnp.bfloat16)
    f32 = jnp.float32
    scale = 1.0 / math.sqrt(hd)

    # Fold 1/sqrt(hd) into the Q columns of the fused QKV weight / bias (free).
    w_qkv_s = jnp.concatenate([w_qkv[:, :C] * scale, w_qkv[:, C:]], axis=1)
    b_qkv_s = jnp.concatenate([b_qkv[:C] * scale, b_qkv[C:]], axis=0)

    # ---- Hoisted fused QKV projection: one lane-dense (B*T, C) x (C, 3C) GEMM
    qkv = _linear(x.reshape(B * T, C).astype(cdt),
                  w_qkv_s.astype(cdt), b_qkv_s.astype(f32), out_dtype=cdt)
    qkv = qkv.reshape(B, T, 3, n_head, hd)
    q = jnp.transpose(qkv[:, :, 0], (0, 2, 1, 3))      # (B, H, T, hd), scaled
    k = jnp.transpose(qkv[:, :, 1], (0, 2, 1, 3))
    v = jnp.transpose(qkv[:, :, 2], (0, 2, 1, 3))

    # c_proj weights: (C, C) reshaped head-major on the *input* dim only; the
    # last dim stays C -> no hd lane padding in VMEM.
    wp_h = w_proj.reshape(n_head, hd, C).astype(cdt)
    bp = b_proj.reshape(1, C).astype(f32)

    kernel = _flash_attn_kernel(n_head, hd, C, tq, tk, cdt, use_approx)
    nq, nk = T // tq, T // tk

    def q_index(b, qi, ki):
        return (b, 0, qi, 0)

    def kv_index(b, qi, ki):
        # Clamp skipped (above-diagonal) KV blocks to the last needed block so
        # Pallas re-uses the resident buffer instead of DMA-ing a block whose
        # compute is pl.when-skipped.
        return (b, 0, jnp.minimum(ki, (qi * tq + tq - 1) // tk), 0)

    const3 = lambda b, qi, ki: (0, 0, 0)
    const2 = lambda b, qi, ki: (0, 0)

    return pl.pallas_call(
        kernel,
        out_shape=jax.ShapeDtypeStruct((B, T, C), x.dtype),
        grid_spec=pltpu.PrefetchScalarGridSpec(
            num_scalar_prefetch=0,
            grid=(B, nq, nk),
            in_specs=[
                pl.BlockSpec((1, n_head, tq, hd), q_index),    # q (scaled)
                pl.BlockSpec((1, n_head, tk, hd), kv_index),   # k
                pl.BlockSpec((1, n_head, tk, hd), kv_index),   # v
                pl.BlockSpec((n_head, hd, C), const3),         # Wproj
                pl.BlockSpec((1, C), const2),                  # bproj
            ],
            out_specs=pl.BlockSpec((1, tq, C), lambda b, qi, ki: (b, qi, 0)),
            scratch_shapes=[
                # TODO(synk): (H, tq, 1) pads the lane dim to 128; fold heads
                # into the lane dim if VMEM pressure ever matters here.
                pltpu.VMEM((n_head, tq, 1), f32),     # running row max
                pltpu.VMEM((n_head, tq, 1), f32),     # running row sum
                pltpu.VMEM((n_head, tq, hd), f32),    # output accumulator
            ]),
        compiler_params=pltpu.CompilerParams(
            dimension_semantics=("parallel", "parallel", "arbitrary"),
            vmem_limit_bytes=vmem_limit_bytes),
    )(q, k, v, wp_h, bp)


def _reference(x, w_qkv, b_qkv, w_proj, b_proj, n_head):
    """Plain-JAX reference mirroring the PyTorch forward (f32, highest prec)."""
    B, T, C = x.shape
    hd = C // n_head
    qkv = jnp.einsum("btc,cd->btd", x, w_qkv, precision="highest") + b_qkv
    q, k, v = jnp.split(qkv, 3, axis=2)

    def heads(t):  # (B,T,C) -> (B,H,T,hd)
        return t.reshape(B, T, n_head, hd).transpose(0, 2, 1, 3)

    q, k, v = heads(q), heads(k), heads(v)
    s = jnp.einsum("bhqd,bhkd->bhqk", q, k, precision="highest") / math.sqrt(hd)
    mask = jnp.tril(jnp.ones((T, T), dtype=bool))
    s = jnp.where(mask, s, -jnp.inf)
    p = jax.nn.softmax(s, axis=-1)
    y = jnp.einsum("bhqk,bhkd->bhqd", p, v, precision="highest")
    y = y.transpose(0, 2, 1, 3).reshape(B, T, C)
    return jnp.einsum("btc,cd->btd", y, w_proj, precision="highest") + b_proj


if __name__ == "__main__":
    # Small GPT-like config (scaled-down GPT-2): C multiple of 128 so the
    # output lane dim is dense; T > block so flash tiling, the online softmax,
    # the interior/diagonal mask split and the DMA-clamped causal skip all run.
    B, T, C, n_head = 2, 128, 128, 4

    key = jax.random.PRNGKey(0)
    kx, k1, k2, k3, k4 = jax.random.split(key, 5)

    x = jax.random.normal(kx, (B, T, C), dtype=jnp.float32)
    # nn.Linear(C, 3C): weight (3C, C) stored transposed as (C, 3C); bias (3C,)
    w_qkv = jax.random.normal(k1, (C, 3 * C), dtype=jnp.float32) / math.sqrt(C)
    b_qkv = jax.random.normal(k2, (3 * C,), dtype=jnp.float32) * 0.01
    # nn.Linear(C, C): weight stored transposed as (C, C); bias (C,)
    w_proj = jax.random.normal(k3, (C, C), dtype=jnp.float32) / math.sqrt(C)
    b_proj = jax.random.normal(k4, (C,), dtype=jnp.float32) * 0.01

    ref = _reference(x, w_qkv, b_qkv, w_proj, b_proj, n_head)

    # f32 compute path, small tiles: checks the tiled online-softmax algorithm,
    # the interior/diagonal split and the clamped causal block skip.
    out_f32 = causal_self_attention(
        x, w_qkv, b_qkv, w_proj, b_proj, n_head=n_head,
        block_q=64, block_k=64, compute_dtype=jnp.float32)
    out_f32 = jax.block_until_ready(out_f32)
    assert out_f32.shape == (B, T, C)
    assert jnp.allclose(out_f32, ref, atol=2e-2, rtol=2e-2), "f32 kernel mismatch"

    # bf16 compute path, small tiles (MXU-native, f32 accumulation).
    out_bf16 = causal_self_attention(
        x, w_qkv, b_qkv, w_proj, b_proj, n_head=n_head,
        block_q=64, block_k=64, compute_dtype=jnp.bfloat16)
    out_bf16 = jax.block_until_ready(out_bf16)
    assert out_bf16.shape == (B, T, C)
    assert jnp.allclose(out_bf16, ref, atol=5e-2, rtol=5e-2), "bf16 kernel mismatch"

    # Default (recommended) tile config, bf16: single-KV-block path.
    out_def = causal_self_attention(
        x, w_qkv, b_qkv, w_proj, b_proj, n_head=n_head,
        compute_dtype=jnp.bfloat16)
    out_def = jax.block_until_ready(out_def)
    assert jnp.allclose(out_def, ref, atol=5e-2, rtol=5e-2), "default-tile mismatch"

    print("KERNEL_OK")
</pallas_src>

<mosaic_0001>
module attributes {stable_mosaic.version = 11 : i64} {
  func.func @_matmul_bias_kernel(%arg0: i32, %arg1: i32, %arg2: i32, %arg3: memref<256x128xf32, #tpu.memory_space<vmem>>, %arg4: memref<128x128xf32, #tpu.memory_space<vmem>>, %arg5: memref<1x128xf32, #tpu.memory_space<vmem>>, %arg6: memref<256x128xf32, #tpu.memory_space<vmem>>, %arg7: memref<256x128xf32, #tpu.memory_space<vmem>>) attributes {dimension_semantics = [#tpu.dimension_semantics<parallel>, #tpu.dimension_semantics<parallel>, #tpu.dimension_semantics<arbitrary>], iteration_bounds = array<i64: 1, 3, 1>, scalar_prefetch = 0 : i64, scratch_operands = 1 : i64, tpu.core_type = #tpu.core_type<tc>, window_params = [{transform_indices = @transform_0, window_bounds = array<i64: 256, 128>}, {transform_indices = @transform_1, window_bounds = array<i64: 128, 128>}, {transform_indices = @transform_2, window_bounds = array<i64: 1, 128>}, {transform_indices = @transform_3, window_bounds = array<i64: 256, 128>}]} {
    %c0_i32 = arith.constant 0 : i32
    %0 = arith.cmpi eq, %arg2, %c0_i32 : i32
    %1 = arith.extui %0 : i1 to i32
    %c0_i32_0 = arith.constant 0 : i32
    %2 = arith.cmpi ne, %1, %c0_i32_0 : i32
    scf.if %2 {
      %cst_10 = arith.constant 0.000000e+00 : f32
      %12 = vector.broadcast %cst_10 : f32 to vector<256x128xf32>
      %c0_11 = arith.constant 0 : index
      %c0_12 = arith.constant 0 : index
      %13 = vector.load %arg7[%c0_11, %c0_12] : memref<256x128xf32, #tpu.memory_space<vmem>>, vector<256x128xf32>
      tpu.vector_store %arg7[%c0_11, %c0_12], %12 {strides = array<i32>} : memref<256x128xf32, #tpu.memory_space<vmem>>, vector<256x128xf32>,
    } else {
    }
    %c0 = arith.constant 0 : index
    %c0_1 = arith.constant 0 : index
    %3 = vector.load %arg7[%c0, %c0_1] : memref<256x128xf32, #tpu.memory_space<vmem>>, vector<256x128xf32>
    %c0_2 = arith.constant 0 : index
    %c0_3 = arith.constant 0 : index
    %4 = vector.load %arg3[%c0_2, %c0_3] : memref<256x128xf32, #tpu.memory_space<vmem>>, vector<256x128xf32>
    %c0_4 = arith.constant 0 : index
    %c0_5 = arith.constant 0 : index
    %5 = vector.load %arg4[%c0_4, %c0_5] : memref<128x128xf32, #tpu.memory_space<vmem>>, vector<128x128xf32>
    %cst = arith.constant dense<0.000000e+00> : vector<256x128xf32>
    %6 = tpu.matmul %4, %5, %cst {dimension_numbers = #tpu.dot_dimension_numbers<[1], [0], [0], [1], [0, 0, 1, 1], [], []>} : vector<256x128xf32>, vector<128x128xf32>, vector<256x128xf32> -> vector<256x128xf32>
    %7 = arith.addf %3, %6 : vector<256x128xf32>
    %c0_6 = arith.constant 0 : index
    %c0_7 = arith.constant 0 : index
    %8 = vector.load %arg7[%c0_6, %c0_7] : memref<256x128xf32, #tpu.memory_space<vmem>>, vector<256x128xf32>
    tpu.vector_store %arg7[%c0_6, %c0_7], %7 {strides = array<i32>} : memref<256x128xf32, #tpu.memory_space<vmem>>, vector<256x128xf32>,
    %c0_i32_8 = arith.constant 0 : i32
    %9 = arith.cmpi eq, %arg2, %c0_i32_8 : i32
    %10 = arith.extui %9 : i1 to i32
    %c0_i32_9 = arith.constant 0 : i32
    %11 = arith.cmpi ne, %10, %c0_i32_9 : i32
    scf.if %11 {
      %c0_10 = arith.constant 0 : index
      %c0_11 = arith.constant 0 : index
      %12 = vector.load %arg7[%c0_10, %c0_11] : memref<256x128xf32, #tpu.memory_space<vmem>>, vector<256x128xf32>
      %c0_12 = arith.constant 0 : index
      %c0_13 = arith.constant 0 : index
      %13 = vector.load %arg5[%c0_12, %c0_13] : memref<1x128xf32, #tpu.memory_space<vmem>>, vector<1x128xf32>
      %14 = vector.broadcast %13 : vector<1x128xf32> to vector<256x128xf32>
      %15 = arith.addf %12, %14 : vector<256x128xf32>
      %c0_14 = arith.constant 0 : index
      %c0_15 = arith.constant 0 : index
      %16 = vector.load %arg6[%c0_14, %c0_15] : memref<256x128xf32, #tpu.memory_space<vmem>>, vector<256x128xf32>
      tpu.vector_store %arg6[%c0_14, %c0_15], %15 {strides = array<i32>} : memref<256x128xf32, #tpu.memory_space<vmem>>, vector<256x128xf32>,
    } else {
    }
    return
  }
  func.func @transform_0(%arg0: i32, %arg1: i32, %arg2: i32) -> (i32, i32) {
    %c0_i32 = arith.constant 0 : i32
    return %arg0, %arg2 : i32, i32
  }
  func.func @transform_1(%arg0: i32, %arg1: i32, %arg2: i32) -> (i32, i32) {
    %c0_i32 = arith.constant 0 : i32
    return %arg2, %arg1 : i32, i32
  }
  func.func @transform_2(%arg0: i32, %arg1: i32, %arg2: i32) -> (i32, i32) {
    %c0_i32 = arith.constant 0 : i32
    %c0_i32_0 = arith.constant 0 : i32
    return %c0_i32, %arg1 : i32, i32
  }
  func.func @transform_3(%arg0: i32, %arg1: i32, %arg2: i32) -> (i32, i32) {
    %c0_i32 = arith.constant 0 : i32
    return %arg0, %arg1 : i32, i32
  }
}

</mosaic_0001>

<bundles_post_ra>
// kernel: tpu_custom_call.1
= control target key start
LH: loop header
LB: loop body
LE: loop exit
PB: predicated region body
PF: predicated region fallthrough
CT: control target
= control target key end

     0   :  { %8 = vsyncpa [#allocation4], 0  ;;  %s1652_s0 = inlined_call_operand.hbm [shape: f32[256,128], index: 0, kind: input, shape index: {}]   ;;  %s1653_s1 = inlined_call_operand.hbm [shape: f32[128,384], index: 1, kind: input, shape index: {}]   ;;  %s1654_s2 = inlined_call_operand.vmem [shape: f32[1,384], index: 2, kind: input, shape index: {}]   ;;  %s1655_s3 = inlined_call_operand.hbm [shape: f32[256,384], index: 3, kind: output, shape index: {}]  }
   0x1   :  { %9 = vsyncpa [#allocation7], 0 }
   0x2   :  { %11 = vsyncpa [#allocation7 + $0x1], 0 }
   0x3   :  { %12 = vsyncpa [#allocation5], 0 }
   0x4   :  { %14 = vsyncpa [#allocation5 + $0x1], 0  ;;  %s1343_s12 = smov 0   ;;  %s1345_s13 = smov 0  }
   0x5   :  { %s1347_s14 = smov 0   ;;  %s1349_s15 = smov 0  }
   0x6   :  { %s1351_s16 = smov 0   ;;  %s1353_s17 = smov 0  }
   0x7 LB: > { %s897_s18 = sadd.s32 4294967295, %s1312_s17   ;;  %s898_s19 = sadd.s32 4294967294, %s1312_s17   ;;  %s1312_s17 = sphi %s1353_s17, %s20_s17   ;;  %s1308_s16 = sphi %s1351_s16, %s1682_s16   ;;  %s1304_s15 = sphi %s1349_s15, %s1681_s15   ;;  %s1300_s14 = sphi %s1347_s14, %s1680_s14   ;;  %s1296_s13 = sphi %s1345_s13, %s1679_s13   ;;  %s1292_s12 = sphi %s1343_s12, %s1678_s12  }
   0x8   : > { %p83_p0 = scmp.ne.s32.totalorder %s1300_s14, %s1296_s13  ;;  %p84_p1 = scmp.eq.s32.totalorder %s1312_s17, 0 }
   0x9   : > { %p89_p2 = scmp.ne.s32.totalorder %s1296_s13, %s1292_s12  ;;  %p1380_p3 = scmp.eq.s32.totalorder %s897_s18, 0 }
   0xa   : > { %p1384_p4 = por %p84_p1, %p83_p0  ;;  %p141_p5 = scmp.eq.s32.totalorder %s897_s18, 2 }
   0xb   : > { %s1663_s20 = scalar_select %p1380_p3, 1, 0 }
   0xc   : > { %p1390_p6 = por %p1380_p3, %p89_p2  ;;  %p147_p7 = scmp.eq.s32.totalorder %s898_s19, 2 }
   0xd   : > { %p1394_p8 = por %p141_p5, %p83_p0  ;;  %p899_p9 = scmp.ge.s32.totalorder %s1312_s17, 1 }
   0xe   : > { %s1665_s22 = scalar_select %p1390_p6, 1, 0 }
   0xf   : > { %s1666_s23 = scalar_select %p1394_p8, 1, 0 }
  0x10   : > { %p1399_p10 = por %p147_p7, %p89_p2  ;;  %p154_p11 = scmp.lt.s32.totalorder %s1312_s17, 4 }
  0x11   : > { %s1314_s26 = smov [#allocation3]   ;;  %p1110_p0 = scmp.lt.s32.totalorder %s1312_s17, 3 }
  0x12   : > { %s1667_s24 = scalar_select %p1399_p10, 1, 0 }
  0x13   : > { %p1404_p12 = pnand %p899_p9, %p154_p11  ;;  %s170_s27 = sshll.u32 %s1314_s26, 4  ;;  %s171_s27 = int_to_ptr.vmem [resolvable:$true] %s170_s27 }
  0x14   : > { %p1419_p2 = pnand %p1110_p0, %p1384_p4  ;;  %s35_s30 = sadd.s32 1, %s1308_s16 }
  0x15   : > { %s1668_s25 = scalar_select %p1404_p12, 1, 0 }
  0x16   : > { %p1097_p13 = pneg %p1404_p12  ;;  %s1168_s6 = scalar_lea.hbm %s1652_s0, 4096 }
  0x17   : > { %s1670_s29 = scalar_select %p1419_p2, 1, 0 }
  0x18   : > { %p1413_p1 = pnand %p1097_p13, %p1380_p3  ;;  %p1169_p5 = scmp.ne.s32.totalorder %s1652_s0, %s1168_s6 }
  0x19   : > { %p1175_p4 = scmp.lt.u32.totalorder %s1168_s6, %s1652_s0 }
  0x1a   : > { %p1170_p7 = pneg %p1413_p1 }
  0x1c   : > { %p1171_p9 = pnand %p1170_p7, %p1169_p5 }
  0x1e   : > { %p1172_p11 = pneg %p1171_p9 }
  0x20   : > { %p1177_p13 = pnand %p1175_p4, %p1172_p11 }
  0x22   : > { %1180 = shalt.err (!%p1177_p13)
}
  0x23   : > { %s1181_s11 = scalar_lea.vmem %s171_s27, 4096  ;;  %p1189_p6 = scmp.lt.s32.totalorder %s171_s27, %s171_s27 }
  0x24   : > { %p1182_p0 = scmp.ne.s32.totalorder %s171_s27, %s1181_s11  ;;  %p1190_p3 = scmp.lt.s32.totalorder %s1181_s11, %s1181_s11 }
  0x26   : > { %p1184_p10 = pnand %p1182_p0, %p1170_p7  ;;  %p1191_p12 = por %p1190_p3, %p1189_p6 }
  0x28   : > { %p1185_p8 = pneg %p1184_p10 }
  0x2a   : > { %p1192_p2 = pnand %p1191_p12, %p1185_p8 }
  0x2c   : > { %1195 = shalt.err (!%p1192_p2)
}
  0x2d   : > { %s1662_s18 = smov 128   ;;  %s1316_s19 = smov 8  }
  0x2e   : > { %1100 = dma.hbm_to_vmem [thread:$0]  (!%p1413_p1), %s1652_s0, 4096, %s171_s27, [#allocation4], %s1662_s18, %s1662_s18, %s1316_s19  }
  0x2f   : > { %p37_p10 = scmp.ge.s32.totalorder %s35_s30, 3  ;;  %s76_s4 = sadd.s32 1, %s1300_s14 }
  0x30   : > { %s184_s5 = sand.u32 1, %s1300_s14   ;;  %s903_s8 = sshll.u32 %s1308_s16, 7 }
  0x31   : > { %s1684_s30 = smov (%p37_p10, %s35_s30), 0  ;;  %s902_s6 = sshll.u32 %s184_s5, 7 }
  0x32   : > { %s72_s7 = ssub.s32 %s1308_s16, %s1684_s30  ;;  %s1453_s10 = scalar_lea.hbm %s1653_s1, %s903_s8 }
  0x33   : > { %p74_p3 = scmp.eq.s32.totalorder %s72_s7, 0  ;;  %s188_s27 = scalar_lea.vmem [#allocation6], %s902_s6 }
  0x34   : > { %s197_s11 = sshll.u32 %s188_s27, 4  ;;  %s1460_s26 = scalar_lea.sflag [#allocation7], %s184_s5  ;;  %s1458_s11 = int_to_ptr.vmem [resolvable:$true] %s197_s11 }
  0x35   : > { %s1456_s21 = scalar_select %p74_p3, %s1300_s14, %s76_s4  }
  0x36   : > { %s1196_s18 = scalar_lea.hbm %s1453_s10, 2048  ;;  %p1671_p8 = scmp.ne.s32.totalorder %s1670_s29, 0 }
  0x37   : > { %p1197_p6 = scmp.ne.s32.totalorder %s1453_s10, %s1196_s18  ;;  %s1201_s28 = scalar_lea.hbm %s1653_s1, 6144 }
  0x38   : > { %p1198_p12 = pneg %p1671_p8  ;;  %p1202_p5 = scmp.lt.u32.totalorder %s1453_s10, %s1653_s1 }
  0x39   : > { %p1203_p7 = scmp.lt.u32.totalorder %s1201_s28, %s1196_s18  ;;  %p1205_p11 = scmp.lt.u32.totalorder %s1196_s18, %s1453_s10 }
  0x3a   : > { %p1199_p1 = pnand %p1198_p12, %p1197_p6 }
  0x3b   : > { %p1204_p9 = por %p1203_p7, %p1202_p5 }
  0x3c   : > { %p1200_p2 = pneg %p1199_p1 }
  0x3d   : > { %p1206_p4 = por %p1205_p11, %p1204_p9 }
  0x3f   : > { %p1207_p13 = pnand %p1206_p4, %p1200_p2 }
  0x41   : > { %1210 = shalt.err (!%p1207_p13)
}
  0x42   : > { %s1211_s4 = scalar_lea.vmem %s1458_s11, 2048  ;;  %s1317_s5 = smov [#allocation6]  }
  0x43   : > { %p1212_p0 = scmp.ne.s32.totalorder %s1458_s11, %s1211_s4  ;;  %s1216_s27 = sshll.u32 %s1317_s5, 4  ;;  %s1217_s27 = int_to_ptr.vmem [resolvable:$false] %s1216_s27 }
  0x44   : > { %s1218_s7 = scalar_lea.vmem %s1217_s27, 4096  ;;  %p1219_p6 = scmp.lt.s32.totalorder %s1458_s11, %s1217_s27 }
  0x45   : > { %p1214_p10 = pnand %p1212_p0, %p1198_p12  ;;  %p1220_p1 = scmp.lt.s32.totalorder %s1218_s7, %s1211_s4 }
  0x47   : > { %p1215_p3 = pneg %p1214_p10  ;;  %p1221_p5 = por %p1220_p1, %p1219_p6 }
  0x49   : > { %p1222_p7 = pnand %p1221_p5, %p1215_p3 }
  0x4b   : > { %1225 = shalt.err (!%p1222_p7)
}
  0x4c   : > { %s1318_s18 = smov 384   ;;  %s1672_s8 = smov 128  }
  0x4d   : > { %1104 = dma.hbm_to_vmem [thread:$0]  (!%p1671_p8), %s1453_s10, 2048, %s1458_s11, %s1460_s26, %s1318_s18, %s1672_s8, %s1316_s19  }
  0x4e   : > { %p1673_p12 = scmp.ne.s32.totalorder %s1668_s25, 0 }
  0x4f   : > { %p1674_p2 = scmp.ne.s32.totalorder (!%p1673_p12), %s1663_s20, 0 }
  0x50   : > { %215 = sbr.rel (%p1673_p12) target bundleno = 386 (0x182), region = 32 }
  0x57   : > { %1279 = dma.done.wait (%p1674_p2), [#allocation4], 4096  }
  0x58   : > { %1281 = vsyncadd (%p1674_p2), [#allocation4], 4294963200  ;;  %s1497_s28 = sand.u32 1, %s1296_s13   ;;  %p1675_p8 = scmp.ne.s32.totalorder %s1665_s22, 0 }
  0x59   : > { %s906_s29 = sshll.u32 %s1497_s28, 7  ;;  %s222_s6 = scalar_lea.sflag [#allocation7], %s1497_s28 }
  0x5a   : > { %s1501_s9 = scalar_lea.vmem [#allocation6], %s906_s29 }
  0x5b   : > { %1283 = dma.done.wait (%p1675_p8), %s222_s6, 2048  }
  0x5c   : > { %1285 = vsyncadd (%p1675_p8), %s222_s6, 4294965248  ;;  %v357_v0 = vld [vmem:[%s1501_s9] sm:$0xff]  ;;  %v358_v1 = vld [vmem:[%s1501_s9 + $0x8] sm:$0xff]  ;;  %p253_p9 = scmp.lt.s32.totalorder %s1304_s15, 2  ;;  %s907_s10 = sshll.u32 %s1497_s28, 8 }
  0x5d   : > { %v359_v2 = vld [vmem:[%s1501_s9 + $0x10] sm:$0xff]  ;;  %v1041_v3 = vpack.c.bf16 %v358_v1, %v357_v0  ;;  %v360_v4 = vld [vmem:[%s1501_s9 + $0x18] sm:$0xff]  ;;  %v361_v6 = vld [vmem:[%s1501_s9 + $0x20] sm:$0xff]  ;;  %s1535_s11 = scalar_lea.vmem [#allocation8], %s907_s10  ;;  %s910_s26 = sshll.u32 %s1304_s15, 7 }
  0x5e   : > { %v1045_v5 = vpack.c.bf16 %v360_v4, %v359_v2  ;;  %v362_v7 = vld [vmem:[%s1501_s9 + $0x28] sm:$0xff]  ;;  %v325_v9 = vld [vmem:[#allocation3] sm:$0xff]  ;;  %v363_v11 = vld [vmem:[%s1501_s9 + $0x30] sm:$0xff]  ;;  %s254_s20 = scalar_select %p253_p9, %s1304_s15, 2 }
  0x5f   : > { %1042 = vmatprep.subr.bf16.mxu0 %v1041_v3  ;;  %1073 = vmatprep.subr.bf16.mxu1 %v1041_v3  ;;  %v1049_v8 = vpack.c.bf16 %v362_v7, %v361_v6  ;;  %v341_v10 = vld [vmem:[#allocation3 + $0x80] sm:$0xff]  ;;  %v364_v12 = vld [vmem:[%s1501_s9 + $0x38] sm:$0xff]  ;;  %v366_v15 = vld [vmem:[%s1501_s9 + $0x48] sm:$0xff]  ;;  %s784_s4 = sshll.u32 %s1535_s11, 4  ;;  %s1594_s15 = scalar_lea.hbm %s1655_s3, %s910_s26  ;;  %s1598_s4 = int_to_ptr.vmem [resolvable:$true] %s784_s4 }
  0x60   : > { %1044 = vmatpush3.bf16.msra.mxu0 %v1041_v3  ;;  %1081 = vmatpush3.bf16.msra.mxu1 %v1041_v3  ;;  %v1053_v13 = vpack.c.bf16 %v364_v12, %v363_v11  ;;  %v365_v14 = vld [vmem:[%s1501_s9 + $0x40] sm:$0xff]  ;;  %v367_v17 = vld [vmem:[%s1501_s9 + $0x50] sm:$0xff]  ;;  %v368_v18 = vld [vmem:[%s1501_s9 + $0x58] sm:$0xff]  ;;  %s255_s19 = scalar_lea.vmem %s1654_s2, %s254_s20  ;;  %s769_s7 = scalar_lea.sflag [#allocation5], %s1497_s28 }
  0x61   : > { %1046 = vmatprep.subr.bf16.mxu0 %v1045_v5  ;;  %1074 = vmatprep.subr.bf16.mxu1 %v1045_v5  ;;  %v1057_v16 = vpack.c.bf16 %v366_v15, %v365_v14  ;;  %v1061_v19 = vpack.c.bf16 %v368_v18, %v367_v17  ;;  %v369_v20 = vld [vmem:[%s1501_s9 + $0x60] sm:$0xff]  ;;  %v370_v21 = vld [vmem:[%s1501_s9 + $0x68] sm:$0xff]  ;;  %v371_v23 = vld [vmem:[%s1501_s9 + $0x70] sm:$0xff]  ;;  %s1226_s18 = scalar_lea.vmem %s1598_s4, 4096  ;;  %p1676_p4 = scmp.ne.s32.totalorder %s1666_s23, 0 }
  0x62   : > { %993 = vmatprep.mubr.f32.mxu0 %v325_v9  ;;  %1017 = vmatprep.mubr.f32.mxu1 %v341_v10  ;;  %v1065_v22 = vpack.c.bf16 %v370_v21, %v369_v20  ;;  %v372_v24 = vld [vmem:[%s1501_s9 + $0x78] sm:$0xff]  ;;  %v326_v26 = vld [vmem:[#allocation3 + $0x8] sm:$0xff]  ;;  %v327_v28 = vld [vmem:[#allocation3 + $0x10] sm:$0xff]  ;;  %p1227_p11 = scmp.ne.s32.totalorder %s1598_s4, %s1226_s18  ;;  %s1319_s8 = smov [#allocation8]  }
  0x63   : > { %v1069_v25 = vpack.c.bf16 %v372_v24, %v371_v23  ;;  %v342_v27 = vld [vmem:[#allocation3 + $0x88] sm:$0xff]  ;;  %v343_v29 = vld [vmem:[#allocation3 + $0x90] sm:$0xff]  ;;  %v328_v30 = vld [vmem:[#allocation3 + $0x18] sm:$0xff]  ;;  %s1230_s29 = sshll.u32 %s1319_s8, 4  ;;  %s1231_s29 = int_to_ptr.vmem [resolvable:$false] %s1230_s29 }
  0x64   : > { %1048 = vmatpush3.bf16.msra.mxu0 %v1045_v5  ;;  %1082 = vmatpush3.bf16.msra.mxu1 %v1045_v5  ;;  %v344_v31 = vld [vmem:[#allocation3 + $0x98] sm:$0xff]  ;;  %v329_v32 = vld [vmem:[#allocation3 + $0x20] sm:$0xff]  ;;  %v330_v34 = vld [vmem:[#allocation3 + $0x28] sm:$0xff]  ;;  %p1228_p13 = pnand %p1227_p11, %p1676_p4  ;;  %s1232_s6 = scalar_lea.vmem %s1231_s29, 8192 }
  0x65   : > { %1050 = vmatprep.subr.bf16.mxu0 %v1049_v8  ;;  %1075 = vmatprep.subr.bf16.mxu1 %v1049_v8  ;;  %v345_v33 = vld [vmem:[#allocation3 + $0xa0] sm:$0xff]  ;;  %v346_v35 = vld [vmem:[#allocation3 + $0xa8] sm:$0xff]  ;;  %v331_v36 = vld [vmem:[#allocation3 + $0x30] sm:$0xff]  ;;  %p1233_p10 = scmp.lt.s32.totalorder %s1598_s4, %s1231_s29  ;;  %p1234_p3 = scmp.lt.s32.totalorder %s1232_s6, %s1226_s18 }
  0x66   : > { %v347_v37 = vld [vmem:[#allocation3 + $0xb0] sm:$0xff]  ;;  %v332_v38 = vld [vmem:[#allocation3 + $0x38] sm:$0xff]  ;;  %v333_v40 = vld [vmem:[#allocation3 + $0x40] sm:$0xff]  ;;  %p1229_p0 = pneg %p1228_p13 }
  0x67   : > { %v348_v39 = vld [vmem:[#allocation3 + $0xb8] sm:$0xff]  ;;  %v349_v41 = vld [vmem:[#allocation3 + $0xc0] sm:$0xff]  ;;  %v334_v42 = vld [vmem:[#allocation3 + $0x48] sm:$0xff]  ;;  %p1235_p6 = por %p1234_p3, %p1233_p10 }
  0x68   : > { %1052 = vmatpush3.bf16.msra.mxu0 %v1049_v8  ;;  %1083 = vmatpush3.bf16.msra.mxu1 %v1049_v8  ;;  %v350_v43 = vld [vmem:[#allocation3 + $0xc8] sm:$0xff]  ;;  %v335_v44 = vld [vmem:[#allocation3 + $0x50] sm:$0xff]  ;;  %v336_v46 = vld [vmem:[#allocation3 + $0x58] sm:$0xff] }
  0x69   : > { %1054 = vmatprep.subr.bf16.mxu0 %v1053_v13  ;;  %1076 = vmatprep.subr.bf16.mxu1 %v1053_v13  ;;  %v351_v45 = vld [vmem:[#allocation3 + $0xd0] sm:$0xff]  ;;  %v352_v47 = vld [vmem:[#allocation3 + $0xd8] sm:$0xff]  ;;  %v337_v48 = vld [vmem:[#allocation3 + $0x60] sm:$0xff]  ;;  %p1236_p1 = pnand %p1235_p6, %p1229_p0 }
  0x6a   : > { %v353_v49 = vld [vmem:[#allocation3 + $0xe0] sm:$0xff]  ;;  %v338_v50 = vld [vmem:[#allocation3 + $0x68] sm:$0xff]  ;;  %v339_v52 = vld [vmem:[#allocation3 + $0x70] sm:$0xff] }
  0x6b   : > { %v354_v51 = vld [vmem:[#allocation3 + $0xe8] sm:$0xff]  ;;  %v355_v53 = vld [vmem:[#allocation3 + $0xf0] sm:$0xff]  ;;  %v340_v54 = vld [vmem:[#allocation3 + $0x78] sm:$0xff] }
  0x6c   : > { %1056 = vmatpush3.bf16.msra.mxu0 %v1053_v13  ;;  %1084 = vmatpush3.bf16.msra.mxu1 %v1053_v13  ;;  %v356_v55 = vld [vmem:[#allocation3 + $0xf8] sm:$0xff]  ;;  %v1529_v56 = vld [vmem:[%s255_s19] ss:$0 sm:$0xff] }
  0x6d   : > { %1058 = vmatprep.subr.bf16.mxu0 %v1057_v16  ;;  %1077 = vmatprep.subr.bf16.mxu1 %v1057_v16 }
  0x70   : > { %1060 = vmatpush3.bf16.msra.mxu0 %v1057_v16  ;;  %1085 = vmatpush3.bf16.msra.mxu1 %v1057_v16 }
  0x71   : > { %1062 = vmatprep.subr.bf16.mxu0 %v1061_v19  ;;  %1078 = vmatprep.subr.bf16.mxu1 %v1061_v19 }
  0x74   : > { %1064 = vmatpush3.bf16.msra.mxu0 %v1061_v19  ;;  %1086 = vmatpush3.bf16.msra.mxu1 %v1061_v19 }
  0x75   : > { %1066 = vmatprep.subr.bf16.mxu0 %v1065_v22  ;;  %1079 = vmatprep.subr.bf16.mxu1 %v1065_v22 }
  0x78   : > { %1068 = vmatpush3.bf16.msra.mxu0 %v1065_v22  ;;  %1087 = vmatpush3.bf16.msra.mxu1 %v1065_v22 }
  0x79   : > { %1070 = vmatprep.subr.bf16.mxu0 %v1069_v25  ;;  %1080 = vmatprep.subr.bf16.mxu1 %v1069_v25 }
  0x7c   : > { %1072 = vmatpush3.bf16.msra.mxu0 %v1069_v25  ;;  %1088 = vmatpush3.bf16.msra.mxu1 %v1069_v25 }
  0x7f   : > { %994 = vmatmul.mubr.f32.vlgmr.msra.gmra.mrb[0].mxu0 %v326_v26  ;;  %1018 = vmatmul.mubr.f32.vlgmr.msra.gmra.mrb[0].mxu1 %v342_v27 }
  0x80   : > { %996 = vmatprep.mubr.f32.mxu0 %v327_v28  ;;  %1020 = vmatprep.mubr.f32.mxu1 %v343_v29 }
  0x83   : > { %997 = vmatmul.mubr.f32.gmra.mrb[2].mxu0 %v328_v30  ;;  %1021 = vmatmul.mubr.f32.gmra.mrb[2].mxu1 %v344_v31 }
  0x84   : > { %999 = vmatprep.mubr.f32.mxu0 %v329_v32  ;;  %1023 = vmatprep.mubr.f32.mxu1 %v345_v33 }
  0x87   : > { %1000 = vmatmul.mubr.f32.gmra.mrb[4].mxu0 %v330_v34  ;;  %1024 = vmatmul.mubr.f32.gmra.mrb[4].mxu1 %v346_v35 }
  0x88   : > { %1002 = vmatprep.mubr.f32.mxu0 %v331_v36  ;;  %1026 = vmatprep.mubr.f32.mxu1 %v347_v37 }
  0x8b   : > { %1003 = vmatmul.mubr.f32.gmra.mrb[6].mxu0 %v332_v38  ;;  %1027 = vmatmul.mubr.f32.gmra.mrb[6].mxu1 %v348_v39 }
  0x8c   : > { %1005 = vmatprep.mubr.f32.mxu0 %v333_v40  ;;  %1029 = vmatprep.mubr.f32.mxu1 %v349_v41 }
  0x8f   : > { %1006 = vmatmul.mubr.f32.gmra.mrb[8].mxu0 %v334_v42  ;;  %1030 = vmatmul.mubr.f32.gmra.mrb[8].mxu1 %v350_v43 }
  0x90   : > { %1008 = vmatprep.mubr.f32.mxu0 %v335_v44  ;;  %1032 = vmatprep.mubr.f32.mxu1 %v351_v45 }
  0x93   : > { %1009 = vmatmul.mubr.f32.gmra.mrb[10].mxu0 %v336_v46  ;;  %1033 = vmatmul.mubr.f32.gmra.mrb[10].mxu1 %v352_v47 }
  0x94   : > { %1011 = vmatprep.mubr.f32.mxu0 %v337_v48  ;;  %1035 = vmatprep.mubr.f32.mxu1 %v353_v49 }
  0x97   : > { %1012 = vmatmul.mubr.f32.gmra.mrb[12].mxu0 %v338_v50  ;;  %1036 = vmatmul.mubr.f32.gmra.mrb[12].mxu1 %v354_v51 }
  0x98   : > { %1014 = vmatprep.mubr.f32.mxu0 %v339_v52  ;;  %1038 = vmatprep.mubr.f32.mxu1 %v355_v53 }
  0x9b   : > { %1015 = vmatmul.mubr.f32.gmra.mrb[14].mxu0 %v340_v54  ;;  %1039 = vmatmul.mubr.f32.gmra.mrb[14].mxu1 %v356_v55 }
 0x152   : > { %v995_v57 = vpop.f32.mrb[0].mxu0  ;;  %v1019_v58 = vpop.f32.mrb[0].mxu1 }
 0x153   : > { %v705_v59 = vadd.f32 %v995_v57, %v1529_v56  ;;  %v721_v60 = vadd.f32 %v1019_v58, %v1529_v56  ;;  %v439_v61 = vpop.f32.mrb[1].mxu0  ;;  %v519_v62 = vpop.f32.mrb[1].mxu1 }
 0x154   : > { %v704_v63 = vadd.f32 %v1529_v56, %v439_v61  ;;  %v720_v0 = vadd.f32 %v1529_v56, %v519_v62 }
 0x155   : > { %737 = vst [vmem:[%s1535_s11 + $0x8] sm:$0xff] %v705_v59  ;;  %753 = vst [vmem:[%s1535_s11 + $0x88] sm:$0xff] %v721_v60 }
 0x156   : > { %736 = vst [vmem:[%s1535_s11] sm:$0xff] %v704_v63  ;;  %752 = vst [vmem:[%s1535_s11 + $0x80] sm:$0xff] %v720_v0  ;;  %v998_v1 = vpop.f32.mrb[2].mxu0  ;;  %v1022_v2 = vpop.f32.mrb[2].mxu1 }
 0x157   : > { %v707_v3 = vadd.f32 %v998_v1, %v1529_v56  ;;  %v723_v4 = vadd.f32 %v1022_v2, %v1529_v56  ;;  %v449_v5 = vpop.f32.mrb[3].mxu0  ;;  %v529_v6 = vpop.f32.mrb[3].mxu1 }
 0x158   : > { %v706_v7 = vadd.f32 %v1529_v56, %v449_v5  ;;  %v722_v8 = vadd.f32 %v1529_v56, %v529_v6 }
 0x159   : > { %739 = vst [vmem:[%s1535_s11 + $0x18] sm:$0xff] %v707_v3  ;;  %755 = vst [vmem:[%s1535_s11 + $0x98] sm:$0xff] %v723_v4 }
 0x15a   : > { %738 = vst [vmem:[%s1535_s11 + $0x10] sm:$0xff] %v706_v7  ;;  %754 = vst [vmem:[%s1535_s11 + $0x90] sm:$0xff] %v722_v8  ;;  %v1001_v9 = vpop.f32.mrb[4].mxu0  ;;  %v1025_v10 = vpop.f32.mrb[4].mxu1 }
 0x15b   : > { %v709_v11 = vadd.f32 %v1001_v9, %v1529_v56  ;;  %v725_v12 = vadd.f32 %v1025_v10, %v1529_v56  ;;  %v459_v13 = vpop.f32.mrb[5].mxu0  ;;  %v539_v14 = vpop.f32.mrb[5].mxu1 }
 0x15c   : > { %v708_v15 = vadd.f32 %v1529_v56, %v459_v13  ;;  %v724_v16 = vadd.f32 %v1529_v56, %v539_v14 }
 0x15d   : > { %741 = vst [vmem:[%s1535_s11 + $0x28] sm:$0xff] %v709_v11  ;;  %757 = vst [vmem:[%s1535_s11 + $0xa8] sm:$0xff] %v725_v12 }
 0x15e   : > { %740 = vst [vmem:[%s1535_s11 + $0x20] sm:$0xff] %v708_v15  ;;  %756 = vst [vmem:[%s1535_s11 + $0xa0] sm:$0xff] %v724_v16  ;;  %v1004_v17 = vpop.f32.mrb[6].mxu0  ;;  %v1028_v18 = vpop.f32.mrb[6].mxu1 }
 0x15f   : > { %v711_v19 = vadd.f32 %v1004_v17, %v1529_v56  ;;  %v727_v20 = vadd.f32 %v1028_v18, %v1529_v56  ;;  %v469_v21 = vpop.f32.mrb[7].mxu0  ;;  %v549_v22 = vpop.f32.mrb[7].mxu1 }
 0x160   : > { %v710_v23 = vadd.f32 %v1529_v56, %v469_v21  ;;  %v726_v24 = vadd.f32 %v1529_v56, %v549_v22 }
 0x161   : > { %743 = vst [vmem:[%s1535_s11 + $0x38] sm:$0xff] %v711_v19  ;;  %759 = vst [vmem:[%s1535_s11 + $0xb8] sm:$0xff] %v727_v20 }
 0x162   : > { %742 = vst [vmem:[%s1535_s11 + $0x30] sm:$0xff] %v710_v23  ;;  %758 = vst [vmem:[%s1535_s11 + $0xb0] sm:$0xff] %v726_v24  ;;  %v1007_v25 = vpop.f32.mrb[8].mxu0  ;;  %v1031_v26 = vpop.f32.mrb[8].mxu1 }
 0x163   : > { %v713_v27 = vadd.f32 %v1007_v25, %v1529_v56  ;;  %v729_v28 = vadd.f32 %v1031_v26, %v1529_v56  ;;  %v479_v29 = vpop.f32.mrb[9].mxu0  ;;  %v559_v30 = vpop.f32.mrb[9].mxu1 }
 0x164   : > { %v712_v31 = vadd.f32 %v1529_v56, %v479_v29  ;;  %v728_v32 = vadd.f32 %v1529_v56, %v559_v30 }
 0x165   : > { %745 = vst [vmem:[%s1535_s11 + $0x48] sm:$0xff] %v713_v27  ;;  %761 = vst [vmem:[%s1535_s11 + $0xc8] sm:$0xff] %v729_v28 }
 0x166   : > { %744 = vst [vmem:[%s1535_s11 + $0x40] sm:$0xff] %v712_v31  ;;  %760 = vst [vmem:[%s1535_s11 + $0xc0] sm:$0xff] %v728_v32  ;;  %v1010_v33 = vpop.f32.mrb[10].mxu0  ;;  %v1034_v34 = vpop.f32.mrb[10].mxu1 }
 0x167   : > { %v715_v35 = vadd.f32 %v1010_v33, %v1529_v56  ;;  %v731_v36 = vadd.f32 %v1034_v34, %v1529_v56  ;;  %v489_v37 = vpop.f32.mrb[11].mxu0  ;;  %v569_v38 = vpop.f32.mrb[11].mxu1 }
 0x168   : > { %v714_v39 = vadd.f32 %v1529_v56, %v489_v37  ;;  %v730_v40 = vadd.f32 %v1529_v56, %v569_v38 }
 0x169   : > { %747 = vst [vmem:[%s1535_s11 + $0x58] sm:$0xff] %v715_v35  ;;  %763 = vst [vmem:[%s1535_s11 + $0xd8] sm:$0xff] %v731_v36 }
 0x16a   : > { %746 = vst [vmem:[%s1535_s11 + $0x50] sm:$0xff] %v714_v39  ;;  %762 = vst [vmem:[%s1535_s11 + $0xd0] sm:$0xff] %v730_v40  ;;  %v1013_v41 = vpop.f32.mrb[12].mxu0  ;;  %v1037_v42 = vpop.f32.mrb[12].mxu1 }
 0x16b   : > { %v717_v43 = vadd.f32 %v1013_v41, %v1529_v56  ;;  %v733_v44 = vadd.f32 %v1037_v42, %v1529_v56  ;;  %v499_v45 = vpop.f32.mrb[13].mxu0  ;;  %v579_v46 = vpop.f32.mrb[13].mxu1 }
 0x16c   : > { %v716_v47 = vadd.f32 %v1529_v56, %v499_v45  ;;  %v732_v48 = vadd.f32 %v1529_v56, %v579_v46 }
 0x16d   : > { %749 = vst [vmem:[%s1535_s11 + $0x68] sm:$0xff] %v717_v43  ;;  %765 = vst [vmem:[%s1535_s11 + $0xe8] sm:$0xff] %v733_v44 }
 0x16e   : > { %748 = vst [vmem:[%s1535_s11 + $0x60] sm:$0xff] %v716_v47  ;;  %764 = vst [vmem:[%s1535_s11 + $0xe0] sm:$0xff] %v732_v48  ;;  %v1016_v49 = vpop.f32.mrb[14].mxu0  ;;  %v1040_v50 = vpop.f32.mrb[14].mxu1 }
 0x16f   : > { %v719_v51 = vadd.f32 %v1016_v49, %v1529_v56  ;;  %v735_v52 = vadd.f32 %v1040_v50, %v1529_v56  ;;  %v509_v53 = vpop.f32.mrb[15].mxu0  ;;  %v589_v54 = vpop.f32.mrb[15].mxu1 }
 0x170   : > { %v718_v55 = vadd.f32 %v1529_v56, %v509_v53  ;;  %v734_v57 = vadd.f32 %v1529_v56, %v589_v54 }
 0x171   : > { %751 = vst [vmem:[%s1535_s11 + $0x78] sm:$0xff] %v719_v51  ;;  %767 = vst [vmem:[%s1535_s11 + $0xf8] sm:$0xff] %v735_v52 }
 0x172   : > { %750 = vst [vmem:[%s1535_s11 + $0x70] sm:$0xff] %v718_v55  ;;  %766 = vst [vmem:[%s1535_s11 + $0xf0] sm:$0xff] %v734_v57 }
 0x173   : > { %1239 = shalt.err (!%p1236_p1)
}
 0x174   : > { %s1240_s9 = scalar_lea.hbm %s1594_s15, 4096  ;;  %s1244_s25 = scalar_lea.hbm %s1655_s3, 12288 }
 0x175   : > { %p1241_p5 = scmp.ne.s32.totalorder %s1594_s15, %s1240_s9  ;;  %p1245_p2 = scmp.lt.u32.totalorder %s1594_s15, %s1655_s3 }
 0x176   : > { %p1246_p8 = scmp.lt.u32.totalorder %s1244_s25, %s1240_s9  ;;  %p1248_p11 = scmp.lt.u32.totalorder %s1240_s9, %s1594_s15 }
 0x177   : > { %p1242_p7 = pnand %p1241_p5, %p1676_p4 }
 0x178   : > { %p1247_p9 = por %p1246_p8, %p1245_p2 }
 0x179   : > { %p1243_p12 = pneg %p1242_p7 }
 0x17a   : > { %p1249_p13 = por %p1248_p11, %p1247_p9 }
 0x17c   : > { %p1250_p0 = pnand %p1249_p13, %p1243_p12 }
 0x17e   : > { %1253 = shalt.err (!%p1250_p0)
}
 0x17f   : > { %s1320_s11 = smov 128   ;;  %s1321_s26 = smov 384  }
 0x180   : > { %s1322_s5 = smov 8  }
 0x181   : > { %1095 = dma.vmem_to_hbm [thread:$0]  (%p1676_p4), %s1598_s4, 4096, %s1594_s15, %s769_s7, %s1320_s11, %s1321_s26, %s1322_s5  }
 0x182 PF: > { %p1112_p10 = scmp.ge.s32.totalorder %s1312_s17, 2  ;;  %s799_s27 = sand.u32 1, %s1292_s12  }
 0x183   : > { %p1677_p3 = scmp.ne.s32.totalorder %s1667_s24, 0  ;;  %s800_s18 = scalar_lea.sflag [#allocation5], %s799_s27 }
 0x185   : > { %p1106_p6 = pnand %p1112_p10, %p1677_p3 }
 0x187   : > { %1287 = dma.done.wait (!%p1106_p6), %s800_s18, 4096  }
 0x188   : > { %1289 = vsyncadd (!%p1106_p6), %s800_s18, 4294963200  ;;  %s20_s17 = sadd.s32 1, %s1312_s17   ;;  %s1678_s12 = smov %s1296_s13 }
 0x189   : > { %p17_p1 = scmp.ge.s32.totalorder %s20_s17, 5   ;;  %s1679_s13 = smov %s1300_s14 }
 0x18a   : > { %s1680_s14 = smov %s1456_s21  ;;  %s1681_s15 = smov %s1308_s16 }
 0x18b   : > { %s1682_s16 = smov %s1684_s30  ;;  %19 = sbr.rel (!%p17_p1) target bundleno = 7 (0x7), region = 94 }
 0x192   :  { %805 = vsyncpa [#allocation4], 1 }
 0x193   :  { %807 = vsyncpa [#allocation4 + $0x1], 1 }
 0x194   :  { %808 = vsyncpa [#allocation7], 1 }
 0x195   :  { %810 = vsyncpa [#allocation7 + $0x1], 1 }
 0x196   :  { %811 = vsyncpa [#allocation5], 1 }
 0x197   :  { %813 = vsyncpa [#allocation5 + $0x1], 1 }

</bundles_post_ra>
